<compile_context>
chip_gen: v6e
topology: v6e:2x2x1
jax: 0.10.0
libtpu: 0.0.40
codegen_flags: <defaults>
</compile_context>

<pallas_src>
import jax
import jax.numpy as jnp
from jax.experimental import pallas as pl
from jax.experimental.pallas import tpu as pltpu


def _round_up(x, m):
    return (x + m - 1) // m * m


def _largest_divisor_tile(total, target, quantum=128):
    """Largest multiple of `quantum` that divides `total` and is <= target."""
    t = min(target, total)
    t = max((t // quantum) * quantum, quantum)
    while t > quantum and total % t != 0:
        t -= quantum
    return t


# Explicit scoped-VMEM limit: raises v5e's 16 MiB default, equals the v6e/v7x
# defaults; every kernel below is sized to stay well under it.
_VMEM_LIMIT_BYTES = 32 << 20


# ----------------------------------------------------------------------------
# Pallas kernels
# ----------------------------------------------------------------------------
def _proj_kernel(x_ref, w_ref, b_ref, o_ref):
    # Single-K-step path (tk == H_pad): no accumulator, no init/finalize.
    acc = jnp.dot(x_ref[...], w_ref[...], preferred_element_type=jnp.float32)
    o_ref[...] = (acc + b_ref[...]).astype(o_ref.dtype)


def _proj_kernel_ktiled(x_ref, w_ref, b_ref, o_ref, acc_ref):
    # K-tiled path: f32 VMEM accumulator, bf16 output writeback.
    k = pl.program_id(2)

    @pl.when(k == 0)
    def _():
        acc_ref[...] = jnp.zeros_like(acc_ref)

    acc_ref[...] += jnp.dot(
        x_ref[...], w_ref[...], preferred_element_type=jnp.float32
    )

    @pl.when(k == pl.num_programs(2) - 1)
    def _():
        o_ref[...] = (acc_ref[...] + b_ref[...]).astype(o_ref.dtype)


def _log_softmax_kernel(x_ref, o_ref):
    x = x_ref[...].astype(jnp.float32)
    m = jnp.max(x, axis=-1, keepdims=True)
    s = x - m
    lse = jnp.log(jnp.sum(jnp.exp(s), axis=-1, keepdims=True))
    o_ref[...] = (s - lse).astype(o_ref.dtype)


def _softmax_kernel(x_ref, o_ref):
    x = x_ref[...].astype(jnp.float32)
    m = jnp.max(x, axis=-1, keepdims=True)
    e = jnp.exp(x - m)
    denom = jnp.sum(e, axis=-1, keepdims=True)
    # approx=True -> EUP vrcp slot (co-issues with VPU work); probs rows sum to
    # 1 within ~1e-3 relative -- fine here, flag if exact normalization needed.
    o_ref[...] = (e * pl.reciprocal(denom, approx=True)).astype(o_ref.dtype)


# ----------------------------------------------------------------------------
# Pallas wrappers
# ----------------------------------------------------------------------------
def pallas_output_layer(x_bf16, w_bf16, b_f32, *, tm=512, tn=1024, tk=2048):
    """x: (M, H_pad) bf16, w: (H_pad, V_pad) bf16, b: (1, V_pad) f32
    -> logits (M, V_pad) bf16.   H_pad, V_pad must already be 128-multiples
    (done once at decoder construction, not per call)."""
    M, H_pad = x_bf16.shape
    V_pad = w_bf16.shape[1]

    # Row tiling (weight is streamed from HBM once per row tile -> prefer big tm).
    M_pad = _round_up(M, 16)          # bf16 sublane packing
    tm = min(tm, M_pad)
    M_pad = _round_up(M_pad, tm)
    if M_pad != M:
        x_bf16 = jnp.pad(x_bf16, ((0, M_pad - M), (0, 0)))

    tn = _largest_divisor_tile(V_pad, tn)
    # Cover the whole hidden dim per step when it fits (drops the K axis + acc).
    tk = H_pad if H_pad <= tk else _largest_divisor_tile(H_pad, tk)

    m_blocks = M_pad // tm
    # v7x dual-TC: with a single M tile (small-batch decode), make sure the V
    # axis has >= 2 parallel tiles so the second TensorCore gets work.
    if m_blocks == 1 and V_pad // tn < 2 and V_pad % 256 == 0:
        tn = min(tn, V_pad // 2)
    n_blocks = V_pad // tn

    out_shape = jax.ShapeDtypeStruct((M_pad, V_pad), jnp.bfloat16)

    if tk == H_pad:
        out = pl.pallas_call(
            _proj_kernel,
            out_shape=out_shape,
            grid_spec=pltpu.PrefetchScalarGridSpec(
                num_scalar_prefetch=0,
                grid=(m_blocks, n_blocks),
                in_specs=[
                    pl.BlockSpec((tm, tk), lambda i, j: (i, 0)),
                    pl.BlockSpec((tk, tn), lambda i, j: (0, j)),
                    pl.BlockSpec((1, tn), lambda i, j: (0, j)),
                ],
                out_specs=pl.BlockSpec((tm, tn), lambda i, j: (i, j)),
            ),
            compiler_params=pltpu.CompilerParams(
                dimension_semantics=("parallel", "parallel"),
                vmem_limit_bytes=_VMEM_LIMIT_BYTES,
            ),
        )(x_bf16, w_bf16, b_f32)
    else:
        out = pl.pallas_call(
            _proj_kernel_ktiled,
            out_shape=out_shape,
            grid_spec=pltpu.PrefetchScalarGridSpec(
                num_scalar_prefetch=0,
                grid=(m_blocks, n_blocks, H_pad // tk),
                in_specs=[
                    pl.BlockSpec((tm, tk), lambda i, j, k: (i, k)),
                    pl.BlockSpec((tk, tn), lambda i, j, k: (k, j)),
                    pl.BlockSpec((1, tn), lambda i, j, k: (0, j)),
                ],
                out_specs=pl.BlockSpec((tm, tn), lambda i, j, k: (i, j)),
                scratch_shapes=[pltpu.VMEM((tm, tn), jnp.float32)],
            ),
            compiler_params=pltpu.CompilerParams(
                dimension_semantics=("parallel", "parallel", "arbitrary"),
                vmem_limit_bytes=_VMEM_LIMIT_BYTES,
            ),
        )(x_bf16, w_bf16, b_f32)

    if M_pad != M:
        out = out[:M]
    return out


def pallas_normalized_probs(logits_2d, log_probs, *, tm=256):
    """logits_2d: (M, V) (bf16 or f32) -> (log_)softmax over last dim, (M, V) f32.

    Pure HBM-bandwidth kernel.  The vocab dim is never padded (the block's last
    dim is the full V, which Pallas allows regardless of 128-divisibility), so
    there is no extra (M, V) pad copy in HBM.  Rows are padded only when M is
    ragged (rare, cheap)."""
    M, V = logits_2d.shape
    in_b = jnp.dtype(logits_2d.dtype).itemsize
    out_b = 4
    # Keep 2x(in+out) double-buffered blocks under ~12 MiB: safe inside v5e's
    # 16 MiB default scoped VMEM and far under the explicit 32 MiB limit.
    budget = 12 << 20
    tm_max = max(8, ((budget // (2 * V * (in_b + out_b))) // 8) * 8)

    M_pad = _round_up(M, 8)
    tm = min(tm, tm_max, M_pad)
    M_pad = _round_up(M_pad, tm)

    x = logits_2d
    if M_pad != M:
        x = jnp.pad(x, ((0, M_pad - M), (0, 0)))  # pad rows only; sliced off below

    kernel = _log_softmax_kernel if log_probs else _softmax_kernel
    out = pl.pallas_call(
        kernel,
        out_shape=jax.ShapeDtypeStruct((M_pad, V), jnp.float32),
        grid_spec=pltpu.PrefetchScalarGridSpec(
            num_scalar_prefetch=0,
            grid=(M_pad // tm,),
            in_specs=[pl.BlockSpec((tm, V), lambda i: (i, 0))],
            out_specs=pl.BlockSpec((tm, V), lambda i: (i, 0)),
        ),
        compiler_params=pltpu.CompilerParams(
            dimension_semantics=("parallel",),
            vmem_limit_bytes=_VMEM_LIMIT_BYTES,
        ),
    )(x)

    if M_pad != M:
        out = out[:M]
    return out


# ----------------------------------------------------------------------------
# Decoder (mirrors FairseqDecoder's structure)
# ----------------------------------------------------------------------------
class PallasFairseqDecoder:
    def __init__(self, vocab_size, hidden, key):
        self.vocab_size = vocab_size
        self.hidden = hidden
        self.adaptive_softmax = None  # no adaptive softmax branch
        self.onnx_trace = False
        k0, k1, k2 = jax.random.split(key, 3)
        # Canonical f32 parameters (reference / checkpoint fidelity).
        self.embed = (jax.random.normal(k0, (vocab_size, hidden), jnp.float32)
                      * (1.0 / jnp.sqrt(hidden)))
        self.w_out = (jax.random.normal(k1, (hidden, vocab_size), jnp.float32)
                      * (1.0 / jnp.sqrt(hidden)))
        self.b_out = jax.random.normal(k2, (1, vocab_size), jnp.float32) * 0.01

        # Kernel-ready parameters: padded to 128-multiples and cast to bf16 ONCE
        # here, so forward() never re-pads / re-casts the vocab-sized weight.
        h_pad = _round_up(hidden, 128)
        v_pad = _round_up(vocab_size, 128)
        self._h_pad, self._v_pad = h_pad, v_pad
        self._embed_k = jnp.pad(
            self.embed, ((0, 0), (0, h_pad - hidden))).astype(jnp.bfloat16)
        self._w_k = jnp.pad(
            self.w_out, ((0, h_pad - hidden), (0, v_pad - vocab_size))
        ).astype(jnp.bfloat16)
        # Padded vocab columns get a very negative bias so they can never absorb
        # probability mass even if the V_pad->V slice is elided downstream.
        self._b_k = jnp.pad(
            self.b_out, ((0, 0), (0, v_pad - vocab_size)), constant_values=-1e9
        ).astype(jnp.float32)

    def extract_features(self, prev_output_tokens, encoder_out=None):
        # Token-embedding gather from the pre-padded bf16 table (data-dependent
        # gather: plain-JAX glue). Trailing H_pad-H feature columns are zero.
        # TODO(synk): a full concrete decoder stack (attention/FFN) is defined by
        # subclasses of FairseqDecoder, not by this abstract base class.
        feats = jnp.take(self._embed_k, prev_output_tokens, axis=0)  # (B,T,H_pad) bf16
        extra = {"encoder_out": encoder_out}
        return feats, extra

    def output_layer(self, features):
        B, T, Hp = features.shape
        logits = pallas_output_layer(features.reshape(B * T, Hp),
                                     self._w_k, self._b_k)
        logits = logits.reshape(B, T, self._v_pad)
        if self._v_pad != self.vocab_size:
            # TODO(synk): keep V_pad end-to-end (padded bias is -1e9 so those
            # columns get ~0 probability) to avoid this slice copy when the
            # vocab is not 128-aligned.
            logits = logits[..., : self.vocab_size]
        return logits

    def forward(self, prev_output_tokens, encoder_out=None):
        x, extra = self.extract_features(prev_output_tokens, encoder_out=encoder_out)
        x = self.output_layer(x)
        return (x, extra)

    def get_normalized_probs(self, net_output, log_probs, sample=None):
        # adaptive_softmax is None in this instantiation -> plain (log_)softmax.
        logits = net_output[0]
        B, T, V = logits.shape
        out_2d = pallas_normalized_probs(logits.reshape(B * T, V), log_probs)
        return out_2d.reshape(B, T, V)

    def max_positions(self):
        return 1e6


# ----------------------------------------------------------------------------
if __name__ == "__main__":
    B, T, H, V = 2, 8, 32, 128
    key = jax.random.PRNGKey(0)
    k_tok, k_params = jax.random.split(key)

    prev_output_tokens = jax.random.randint(k_tok, (B, T), 0, V, dtype=jnp.int32)
    decoder = PallasFairseqDecoder(vocab_size=V, hidden=H, key=k_params)

    # forward()
    logits, extra = decoder.forward(prev_output_tokens, encoder_out=None)
    logits = jax.block_until_ready(logits)

    # get_normalized_probs()
    log_probs = jax.block_until_ready(
        decoder.get_normalized_probs((logits, extra), log_probs=True))
    probs = jax.block_until_ready(
        decoder.get_normalized_probs((logits, extra), log_probs=False))

    # Reference check against plain JAX (bf16-rounded inputs, f32 accumulate,
    # matching the MXU path; logits themselves are bf16 on the kernel side).
    feats_ref = jnp.take(decoder.embed, prev_output_tokens, axis=0)
    feats_bf = feats_ref.astype(jnp.bfloat16).astype(jnp.float32)
    w_bf = decoder.w_out.astype(jnp.bfloat16).astype(jnp.float32)
    logits_ref = feats_bf @ w_bf + decoder.b_out[0]

    logits_f32 = logits.astype(jnp.float32)
    lp_ref = jax.nn.log_softmax(logits_f32, axis=-1)
    p_ref = jax.nn.softmax(logits_f32, axis=-1)

    assert logits.shape == (B, T, V) and logits.dtype == jnp.bfloat16
    assert jnp.allclose(logits_f32, logits_ref, atol=1e-2, rtol=1e-2)
    assert jnp.allclose(log_probs, lp_ref, atol=2e-3, rtol=2e-3)
    assert jnp.allclose(probs, p_ref, atol=2e-3, rtol=2e-3)
    assert jnp.allclose(jnp.sum(probs, axis=-1), 1.0, atol=5e-3)

    print("KERNEL_OK")
</pallas_src>

<mosaic_0001>
module attributes {stable_mosaic.version = 11 : i64} {
  func.func @_proj_kernel(%arg0: i32, %arg1: i32, %arg2: memref<16x128xbf16, #tpu.memory_space<vmem>>, %arg3: memref<128x128xbf16, #tpu.memory_space<vmem>>, %arg4: memref<1x128xf32, #tpu.memory_space<vmem>>, %arg5: memref<16x128xbf16, #tpu.memory_space<vmem>>) attributes {dimension_semantics = [#tpu.dimension_semantics<parallel>, #tpu.dimension_semantics<parallel>], iteration_bounds = array<i64: 1, 1>, scalar_prefetch = 0 : i64, scratch_operands = 0 : i64, tpu.core_type = #tpu.core_type<tc>, window_params = [{transform_indices = @transform_0, window_bounds = array<i64: 16, 128>}, {transform_indices = @transform_1, window_bounds = array<i64: 128, 128>}, {transform_indices = @transform_2, window_bounds = array<i64: 1, 128>}, {transform_indices = @transform_3, window_bounds = array<i64: 16, 128>}]} {
    %c0 = arith.constant 0 : index
    %c0_0 = arith.constant 0 : index
    %0 = vector.load %arg2[%c0, %c0_0] : memref<16x128xbf16, #tpu.memory_space<vmem>>, vector<16x128xbf16>
    %c0_1 = arith.constant 0 : index
    %c0_2 = arith.constant 0 : index
    %1 = vector.load %arg3[%c0_1, %c0_2] : memref<128x128xbf16, #tpu.memory_space<vmem>>, vector<128x128xbf16>
    %cst = arith.constant dense<0.000000e+00> : vector<16x128xf32>
    %2 = tpu.matmul %0, %1, %cst {dimension_numbers = #tpu.dot_dimension_numbers<[1], [0], [0], [1], [0, 0, 1, 1], [], []>} : vector<16x128xbf16>, vector<128x128xbf16>, vector<16x128xf32> -> vector<16x128xf32>
    %c0_3 = arith.constant 0 : index
    %c0_4 = arith.constant 0 : index
    %3 = vector.load %arg4[%c0_3, %c0_4] : memref<1x128xf32, #tpu.memory_space<vmem>>, vector<1x128xf32>
    %4 = vector.broadcast %3 : vector<1x128xf32> to vector<16x128xf32>
    %5 = arith.addf %2, %4 : vector<16x128xf32>
    %6 = arith.truncf %5 : vector<16x128xf32> to vector<16x128xbf16>
    %c0_5 = arith.constant 0 : index
    %c0_6 = arith.constant 0 : index
    %7 = vector.load %arg5[%c0_5, %c0_6] : memref<16x128xbf16, #tpu.memory_space<vmem>>, vector<16x128xbf16>
    tpu.vector_store %arg5[%c0_5, %c0_6], %6 {strides = array<i32>} : memref<16x128xbf16, #tpu.memory_space<vmem>>, vector<16x128xbf16>,
    return
  }
  func.func @transform_0(%arg0: i32, %arg1: i32) -> (i32, i32) {
    %c0_i32 = arith.constant 0 : i32
    %c0_i32_0 = arith.constant 0 : i32
    return %arg0, %c0_i32 : i32, i32
  }
  func.func @transform_1(%arg0: i32, %arg1: i32) -> (i32, i32) {
    %c0_i32 = arith.constant 0 : i32
    %c0_i32_0 = arith.constant 0 : i32
    return %c0_i32, %arg1 : i32, i32
  }
  func.func @transform_2(%arg0: i32, %arg1: i32) -> (i32, i32) {
    %c0_i32 = arith.constant 0 : i32
    %c0_i32_0 = arith.constant 0 : i32
    return %c0_i32, %arg1 : i32, i32
  }
  func.func @transform_3(%arg0: i32, %arg1: i32) -> (i32, i32) {
    %c0_i32 = arith.constant 0 : i32
    return %arg0, %arg1 : i32, i32
  }
}

</mosaic_0001>

<bundles_post_ra>
// kernel: tpu_custom_call.1
= control target key start
LH: loop header
LB: loop body
LE: loop exit
PB: predicated region body
PF: predicated region fallthrough
CT: control target
= control target key end

     0   :  { %8 = vsyncpa [#allocation3], 0  ;;  %s370_s0 = inlined_call_operand.hbm [shape: bf16[16,128], index: 0, kind: input, shape index: {}]   ;;  %s371_s1 = inlined_call_operand.hbm [shape: bf16[128,128], index: 1, kind: input, shape index: {}]   ;;  %s372_s2 = inlined_call_operand.vmem [shape: f32[1,128], index: 2, kind: input, shape index: {}]   ;;  %s373_s3 = inlined_call_operand.hbm [shape: bf16[16,128], index: 3, kind: output, shape index: {}]  }
   0x1   :  { %9 = vsyncpa [#allocation6], 0 }
   0x2   :  { %10 = vsyncpa [#allocation4], 0  ;;  %s322_s12 = smov [#allocation2]  }
   0x3   :  { %s16_s13 = sshll.u32 %s322_s12, 4  ;;  %s17_s13 = int_to_ptr.vmem [resolvable:$true] %s16_s13 }
   0x4   :  { %s264_s14 = scalar_lea.vmem %s17_s13, 128  ;;  %p269_p1 = scmp.lt.s32.totalorder %s17_s13, %s17_s13 }
   0x5   :  { %p265_p0 = scmp.ne.s32.totalorder %s17_s13, %s264_s14  ;;  %p270_p2 = scmp.lt.s32.totalorder %s264_s14, %s264_s14 }
   0x7   :  { %p271_p3 = por %p270_p2, %p269_p1 }
   0x9   :  { %p272_p4 = pnand %p271_p3, %p265_p0 }
   0xb   :  { %275 = shalt.err (!%p272_p4)
}
   0xc   :  { %s323_s15 = smov 64   ;;  %s324_s16 = smov 4  }
   0xd   :  { %22 = dma.hbm_to_vmem [thread:$0]  %s370_s0, 128, %s17_s13, [#allocation3], %s323_s15, %s323_s15, %s324_s16  }
   0xe   :  { %s325_s19 = smov [#allocation5]  }
   0xf   :  { %s28_s20 = sshll.u32 %s325_s19, 4  ;;  %s29_s20 = int_to_ptr.vmem [resolvable:$true] %s28_s20 }
  0x10   :  { %s284_s21 = scalar_lea.vmem %s29_s20, 1024  ;;  %p289_p6 = scmp.lt.s32.totalorder %s29_s20, %s29_s20 }
  0x11   :  { %p285_p5 = scmp.ne.s32.totalorder %s29_s20, %s284_s21  ;;  %p290_p7 = scmp.lt.s32.totalorder %s284_s21, %s284_s21 }
  0x13   :  { %p291_p8 = por %p290_p7, %p289_p6 }
  0x15   :  { %p292_p9 = pnand %p291_p8, %p285_p5 }
  0x17   :  { %295 = shalt.err (!%p292_p9)
}
  0x18   :  { %34 = dma.hbm_to_vmem [thread:$0]  %s371_s1, 1024, %s29_s20, [#allocation6], %s323_s15, %s323_s15, %s324_s16  }
  0x19   :  { %316 = dma.done.wait [#allocation3], 128  }
  0x1a   :  { %317 = vsyncadd [#allocation3], 4294967168 }
  0x1b   :  { %318 = dma.done.wait [#allocation6], 1024  }
  0x1c   :  { %319 = vsyncadd [#allocation6], 4294966272  ;;  %v326_v0 = vmov 0.0   ;;  %vm327_vm0 = vmmov 0   ;;  %v247_v1 = vld [vmem:[#allocation5 + $0x38] sm:$0xff]   ;;  %v248_v2 = vld [vmem:[#allocation5 + $0x30] sm:$0xff]  }
  0x1d   :  { %220 = vmatprep.subr.bf16.mxu0 %v326_v0  ;;  %236 = vmatprep.mubr.msk.bf16.mxu0 %vm327_vm0, %v326_v0  ;;  %v249_v3 = vld [vmem:[#allocation5 + $0x28] sm:$0xff]   ;;  %v250_v4 = vld [vmem:[#allocation5 + $0x20] sm:$0xff]   ;;  %v251_v5 = vld [vmem:[#allocation5 + $0x18] sm:$0xff]   ;;  %s328_s24 = smov [#allocation7]  }
  0x1e   :  { %221 = vmatpush3.bf16.msra.mxu0 %v247_v1  ;;  %v252_v6 = vld [vmem:[#allocation5 + $0x10] sm:$0xff]   ;;  %v253_v7 = vld [vmem:[#allocation5 + $0x8] sm:$0xff]   ;;  %v254_v8 = vld [vmem:[#allocation5] sm:$0xff]   ;;  %s179_s25 = sshll.u32 %s328_s24, 4  ;;  %s180_s25 = int_to_ptr.vmem [resolvable:$true] %s179_s25 }
  0x1f   :  { %222 = vmatprep.subr.bf16.mxu0 %v326_v0  ;;  %v255_v9 = vld [vmem:[#allocation2] sm:$0xff]   ;;  %s296_s26 = scalar_lea.vmem %s180_s25, 128  ;;  %p301_p11 = scmp.lt.s32.totalorder %s180_s25, %s180_s25 }
  0x20   :  { %v192_v11 = vld [vmem:[%s372_s2] ss:$0 sm:$0xff]  ;;  %p297_p10 = scmp.ne.s32.totalorder %s180_s25, %s296_s26  ;;  %p302_p12 = scmp.lt.s32.totalorder %s296_s26, %s296_s26 }
  0x22   :  { %223 = vmatpush3.bf16.msra.mxu0 %v248_v2  ;;  %p303_p13 = por %p302_p12, %p301_p11 }
  0x23   :  { %224 = vmatprep.subr.bf16.mxu0 %v326_v0 }
  0x24   :  { %p304_p0 = pnand %p303_p13, %p297_p10 }
  0x26   :  { %225 = vmatpush3.bf16.msra.mxu0 %v249_v3 }
  0x27   :  { %226 = vmatprep.subr.bf16.mxu0 %v326_v0 }
  0x2a   :  { %227 = vmatpush3.bf16.msra.mxu0 %v250_v4 }
  0x2b   :  { %228 = vmatprep.subr.bf16.mxu0 %v326_v0 }
  0x2e   :  { %229 = vmatpush3.bf16.msra.mxu0 %v251_v5 }
  0x2f   :  { %230 = vmatprep.subr.bf16.mxu0 %v326_v0 }
  0x32   :  { %231 = vmatpush3.bf16.msra.mxu0 %v252_v6 }
  0x33   :  { %232 = vmatprep.subr.bf16.mxu0 %v326_v0 }
  0x36   :  { %233 = vmatpush3.bf16.msra.mxu0 %v253_v7 }
  0x37   :  { %234 = vmatprep.subr.bf16.mxu0 %v326_v0 }
  0x3a   :  { %235 = vmatpush3.bf16.msra.mxu0 %v254_v8 }
  0x3d   :  { %237 = vmatmul.mubr.bf16.vlgmr.msra.gmra.mxu0 %v255_v9 }
  0xfd   :  { %v157_v10 = vpop.f32.mrf.mxu0 }
  0xfe   :  { %v158_v14 = vadd.f32 %v192_v11, %v157_v10 }
  0xff   :  { %v238_v12 = vpop.f32.mrf.mxu0 }
 0x101   :  { %v160_v13 = vpop.f32.mrf.mxu0 }
 0x102   :  { %v161_v15 = vadd.f32 %v192_v11, %v160_v13 }
 0x103   :  { %v239_v16 = vpop.f32.mrf.mxu0 }
 0x104   :  { %v209_v17 = vpack.c.bf16 %v161_v15, %v158_v14 }
 0x106   :  { %210 = vst [vmem:[#allocation7] sm:$0xff] %v209_v17  }
 0x107   :  { %307 = shalt.err (!%p304_p0)
}
 0x108   :  { %185 = dma.vmem_to_hbm [thread:$0]  %s180_s25, 128, %s373_s3, [#allocation4], %s323_s15, %s323_s15, %s324_s16  }
 0x109   :  { %320 = dma.done.wait [#allocation4], 128  }
 0x10a   :  { %321 = vsyncadd [#allocation4], 4294967168 }
 0x10b   :  { %189 = vsyncpa [#allocation3], 1 }
 0x10c   :  { %190 = vsyncpa [#allocation6], 1 }
 0x10d   :  { %191 = vsyncpa [#allocation4], 1 }

</bundles_post_ra>
